<compile_context>
chip_gen: v5e
topology: v5e:2x2
jax: 0.10.0
libtpu: 0.0.40
codegen_flags: <defaults>
</compile_context>

<pallas_src>
import functools

import jax
import jax.numpy as jnp
from jax.experimental import pallas as pl
from jax.experimental.pallas import tpu as pltpu


def _fused_siamese_kernel(batch_tile, num_prev, num_hidden_layers, activation,
                          ids_ref, *refs):
    """Fused one-hot gathers + shared siamese MLP + left-right diff, one tile.

    ids_ref   : VMEM (Bt, 3+P) int32   cols = [user, left, right, prev_0, ...]
    user_ref  : VMEM (U, H)            user embedding table
    next_ref  : VMEM (V, H)            next-item embedding table
    prev_refs : P x VMEM (V, H)        previous-item embedding tables
    wh_ref    : VMEM (L-1, H, H)       hidden Linear weights (absent if L == 1)
    bh_ref    : VMEM (L-1, 1, H)       hidden Linear biases  (absent if L == 1)
    wo_ref    : VMEM (1, H)            output Linear weight (row layout)
    bo_ref    : VMEM (1, 1)            output Linear bias
    out_ref   : VMEM (1, Bt)           lane-dense left-right difference
    """
    refs = list(refs)
    user_ref = refs.pop(0)
    next_ref = refs.pop(0)
    prev_refs = [refs.pop(0) for _ in range(num_prev)]
    has_hidden = num_hidden_layers > 1
    wh_ref = refs.pop(0) if has_hidden else None
    bh_ref = refs.pop(0) if has_hidden else None
    wo_ref = refs.pop(0)
    bo_ref = refs.pop(0)
    out_ref = refs.pop(0)

    ids = ids_ref[...]                                        # (Bt, 3+P) int32

    # ---- vectorized embedding gathers via one-hot MXU matmuls ---------------
    def gather(table_ref, col):
        vocab = table_ref.shape[0]
        idx = ids[:, col:col + 1]                             # (Bt, 1)
        onehot = (idx == jax.lax.broadcasted_iota(
            jnp.int32, (batch_tile, vocab), 1)).astype(jnp.float32)
        # Exact for f32 one-hot: each row sums one table row.
        return jnp.dot(onehot, table_ref[...],
                       preferred_element_type=jnp.float32)    # (Bt, H)

    shared = gather(user_ref, 0)                              # user embedding
    for p in range(num_prev):
        shared = shared + gather(prev_refs[p], 3 + p)         # prev items
    left = shared + gather(next_ref, 1)
    right = shared + gather(next_ref, 2)
    x = jnp.concatenate([left, right], axis=0)                # (2*Bt, H)

    # ---- shared siamese MLP on the stacked (2*Bt, H) block ------------------
    def _sigmoid(v):
        # Exact (non-approx) reciprocal to stay bit-close to the f32 reference.
        return pl.reciprocal(1.0 + jnp.exp(-v), approx=False)

    def act(v):
        if activation == "relu":
            return jnp.maximum(v, 0.0)
        if activation == "tanh":
            return jnp.tanh(v)
        return _sigmoid(v)                                    # "sigmoid"

    h = act(x)                                                # layer 0: act only
    for li in range(1, num_hidden_layers):                    # layers 1..L-1
        h = act(jnp.dot(h, wh_ref[li - 1],
                        preferred_element_type=jnp.float32) + bh_ref[li - 1])

    # ---- output head: Linear(H,1)+Sigmoid as VPU mul + XLU reduce -----------
    # Produces a lane-dense (1, Bt) row (batch on the lane axis) so the final
    # store is not a lane-width-1 masked store.
    def head(h_half):                                         # (Bt, H) -> (1, Bt)
        prod = h_half * wo_ref[...]                           # VPU elementwise
        logit = jnp.sum(prod.T, axis=0, keepdims=True) + bo_ref[...]
        return _sigmoid(logit)

    out_ref[...] = head(h[:batch_tile]) - head(h[batch_tile:])


def siamese_recnet_forward(params, user_ids, left_item_ids, right_item_ids,
                           prev_item_ids_list, *, num_hidden_layers,
                           activation, batch_tile=None):
    """Embedding gathers, siamese MLP and left-right diff in one Pallas call."""
    B = user_ids.shape[0]
    P = len(prev_item_ids_list)
    has_hidden = num_hidden_layers > 1

    if batch_tile is None:
        batch_tile = B if B <= 512 else 512
    assert B % batch_tile == 0 and batch_tile % 8 == 0
    num_tiles = B // batch_tile
    if num_tiles > 1:
        # Lane-dense (1, batch_tile) output blocks need 128-aligned tiles.
        assert batch_tile % 128 == 0

    # (B, 3+P) int32 id matrix, tiled along the batch (sublane) axis.
    ids = jnp.stack([user_ids, left_item_ids, right_item_ids,
                     *prev_item_ids_list], axis=1).astype(jnp.int32)

    def const_spec(a):  # whole-array VMEM block, constant across the grid
        return pl.BlockSpec(a.shape, lambda i, nd=a.ndim: (0,) * nd)

    operands = [params["user_emb"], params["next_emb"], *params["prev_embs"]]
    if has_hidden:
        operands += [params["wh"], params["bh"]]
    operands += [params["wo"], params["bo"]]

    in_specs = [pl.BlockSpec((batch_tile, 3 + P), lambda i: (i, 0))]
    in_specs += [const_spec(a) for a in operands]

    kernel = functools.partial(_fused_siamese_kernel, batch_tile, P,
                               num_hidden_layers, activation)

    out = pl.pallas_call(
        kernel,
        out_shape=jax.ShapeDtypeStruct((1, B), jnp.float32),
        grid_spec=pltpu.PrefetchScalarGridSpec(
            num_scalar_prefetch=0,
            grid=(num_tiles,),
            in_specs=in_specs,
            out_specs=pl.BlockSpec((1, batch_tile), lambda i: (0, i)),
        ),
        compiler_params=pltpu.CompilerParams(
            dimension_semantics=("parallel",)),
    )(ids, *operands)
    # The PyTorch module returns (B, 1); reshape on the host/XLA side.
    return out.reshape(B, 1)


def _xavier_uniform(key, shape):
    fan_in, fan_out = shape[-2], shape[-1]
    bound = jnp.sqrt(6.0 / (fan_in + fan_out))
    return jax.random.uniform(key, shape, jnp.float32, -bound, bound)


def make_params(key, *, num_users, num_items, num_previous_items,
                num_hidden_layers, hidden):
    keys = jax.random.split(key, 6 + num_previous_items)
    next_emb = _xavier_uniform(keys[0], (num_items + 1, hidden))
    user_emb = _xavier_uniform(keys[1], (num_users, hidden))
    prev_embs = [
        _xavier_uniform(keys[2 + i], (num_items + 1, hidden))
        for i in range(num_previous_items)
    ]
    params = {"next_emb": next_emb, "user_emb": user_emb,
              "prev_embs": prev_embs}
    # Hidden Linears exist only for layers 1..L-1 (layer 0 is activation only);
    # do NOT allocate a dummy weight when num_hidden_layers == 1.
    n_hidden_lin = num_hidden_layers - 1
    if n_hidden_lin > 0:
        params["wh"] = _xavier_uniform(keys[-4],
                                       (n_hidden_lin, hidden, hidden))
        params["bh"] = 0.01 * jax.random.normal(
            keys[-3], (n_hidden_lin, 1, hidden), jnp.float32)
    params["wo"] = _xavier_uniform(keys[-2], (1, hidden))   # Linear(H,1) weight
    params["bo"] = 0.01 * jax.random.normal(keys[-1], (1, 1), jnp.float32)
    return params


def _reference_forward(params, user_ids, left_item_ids, right_item_ids,
                       prev_item_ids_list, *, num_hidden_layers, activation):
    """Pure-JAX reference of the same forward, for a correctness check."""
    user_e = params["user_emb"][user_ids]
    left = params["next_emb"][left_item_ids] + user_e
    right = params["next_emb"][right_item_ids] + user_e
    for i, pids in enumerate(prev_item_ids_list):
        pe = params["prev_embs"][i][pids]
        left = left + pe
        right = right + pe

    def act(x):
        if activation == "relu":
            return jnp.maximum(x, 0.0)
        if activation == "tanh":
            return jnp.tanh(x)
        return jax.nn.sigmoid(x)

    def half(x):
        h = act(x)
        for i in range(1, num_hidden_layers):
            h = act(jnp.dot(h, params["wh"][i - 1],
                            precision=jax.lax.Precision.HIGHEST)
                    + params["bh"][i - 1])
        logit = jnp.sum(h * params["wo"], axis=-1, keepdims=True) + params["bo"]
        return jax.nn.sigmoid(logit)

    return half(left) - half(right)


if __name__ == "__main__":
    # Small, self-consistent configuration (hidden lane-aligned to 128).
    num_users = 8
    num_items = 16
    num_previous_items = 2
    num_hidden_layers = 2
    hidden = 128           # num_hidden_units == embedding_size (model requires)
    batch = 8
    activation = "relu"

    root = jax.random.PRNGKey(0)
    pkey, ikey = jax.random.split(root)
    params = make_params(pkey, num_users=num_users, num_items=num_items,
                         num_previous_items=num_previous_items,
                         num_hidden_layers=num_hidden_layers, hidden=hidden)

    ik = jax.random.split(ikey, 3 + num_previous_items)
    user_ids = jax.random.randint(ik[0], (batch,), 0, num_users)
    left_item_ids = jax.random.randint(ik[1], (batch,), 0, num_items + 1)
    right_item_ids = jax.random.randint(ik[2], (batch,), 0, num_items + 1)
    prev_item_ids_list = [
        jax.random.randint(ik[3 + i], (batch,), 0, num_items + 1)
        for i in range(num_previous_items)
    ]

    out = siamese_recnet_forward(
        params, user_ids, left_item_ids, right_item_ids, prev_item_ids_list,
        num_hidden_layers=num_hidden_layers, activation=activation)
    out = jax.block_until_ready(out)

    ref = _reference_forward(
        params, user_ids, left_item_ids, right_item_ids, prev_item_ids_list,
        num_hidden_layers=num_hidden_layers, activation=activation)

    assert out.shape == (batch, 1), out.shape
    assert jnp.allclose(out, ref, atol=1e-4, rtol=1e-4), (out, ref)
    print("KERNEL_OK")
</pallas_src>

<mosaic_0001>
module attributes {stable_mosaic.version = 11 : i64} {
  func.func @_fused_siamese_kernel(%arg0: i32, %arg1: memref<8x5xi32, #tpu.memory_space<vmem>>, %arg2: memref<8x128xf32, #tpu.memory_space<vmem>>, %arg3: memref<17x128xf32, #tpu.memory_space<vmem>>, %arg4: memref<17x128xf32, #tpu.memory_space<vmem>>, %arg5: memref<17x128xf32, #tpu.memory_space<vmem>>, %arg6: memref<1x128x128xf32, #tpu.memory_space<vmem>>, %arg7: memref<1x1x128xf32, #tpu.memory_space<vmem>>, %arg8: memref<1x128xf32, #tpu.memory_space<vmem>>, %arg9: memref<1x1xf32, #tpu.memory_space<vmem>>, %arg10: memref<1x8xf32, #tpu.memory_space<vmem>>) attributes {dimension_semantics = [#tpu.dimension_semantics<parallel>], iteration_bounds = array<i64: 1>, scalar_prefetch = 0 : i64, scratch_operands = 0 : i64, tpu.core_type = #tpu.core_type<tc>, window_params = [{transform_indices = @transform_0, window_bounds = array<i64: 8, 5>}, {pipeline_mode = #tpu.pipeline_mode<synchronous>, transform_indices = @transform_1, window_bounds = array<i64: 8, 128>}, {pipeline_mode = #tpu.pipeline_mode<synchronous>, transform_indices = @transform_2, window_bounds = array<i64: 17, 128>}, {pipeline_mode = #tpu.pipeline_mode<synchronous>, transform_indices = @transform_3, window_bounds = array<i64: 17, 128>}, {pipeline_mode = #tpu.pipeline_mode<synchronous>, transform_indices = @transform_4, window_bounds = array<i64: 17, 128>}, {pipeline_mode = #tpu.pipeline_mode<synchronous>, transform_indices = @transform_5, window_bounds = array<i64: 1, 128, 128>}, {pipeline_mode = #tpu.pipeline_mode<synchronous>, transform_indices = @transform_6, window_bounds = array<i64: 1, 1, 128>}, {pipeline_mode = #tpu.pipeline_mode<synchronous>, transform_indices = @transform_7, window_bounds = array<i64: 1, 128>}, {pipeline_mode = #tpu.pipeline_mode<synchronous>, transform_indices = @transform_8, window_bounds = array<i64: 1, 1>}, {transform_indices = @transform_9, window_bounds = array<i64: 1, 8>}]} {
    %c0 = arith.constant 0 : index
    %c0_0 = arith.constant 0 : index
    %0 = vector.load %arg1[%c0, %c0_0] : memref<8x5xi32, #tpu.memory_space<vmem>>, vector<8x5xi32>
    %1 = vector.extract_strided_slice %0 {offsets = [0, 0], sizes = [8, 1], strides = [1, 1]} : vector<8x5xi32> to vector<8x1xi32>
    %2 = tpu.iota {dimensions = array<i32: 1>} : vector<8x8xi32>
    %3 = vector.broadcast %1 : vector<8x1xi32> to vector<8x8xi32>
    %4 = arith.cmpi eq, %3, %2 : vector<8x8xi32>
    %5 = arith.extui %4 : vector<8x8xi1> to vector<8x8xi32>
    %6 = arith.sitofp %5 : vector<8x8xi32> to vector<8x8xf32>
    %c0_1 = arith.constant 0 : index
    %c0_2 = arith.constant 0 : index
    %7 = vector.load %arg2[%c0_1, %c0_2] : memref<8x128xf32, #tpu.memory_space<vmem>>, vector<8x128xf32>
    %cst = arith.constant dense<0.000000e+00> : vector<8x128xf32>
    %8 = tpu.matmul %6, %7, %cst {dimension_numbers = #tpu.dot_dimension_numbers<[1], [0], [0], [1], [0, 0, 1, 1], [], []>} : vector<8x8xf32>, vector<8x128xf32>, vector<8x128xf32> -> vector<8x128xf32>
    %9 = vector.extract_strided_slice %0 {offsets = [0, 3], sizes = [8, 1], strides = [1, 1]} : vector<8x5xi32> to vector<8x1xi32>
    %10 = tpu.iota {dimensions = array<i32: 1>} : vector<8x17xi32>
    %11 = vector.broadcast %9 : vector<8x1xi32> to vector<8x17xi32>
    %12 = arith.cmpi eq, %11, %10 : vector<8x17xi32>
    %13 = arith.extui %12 : vector<8x17xi1> to vector<8x17xi32>
    %14 = arith.sitofp %13 : vector<8x17xi32> to vector<8x17xf32>
    %c0_3 = arith.constant 0 : index
    %c0_4 = arith.constant 0 : index
    %15 = vector.load %arg4[%c0_3, %c0_4] : memref<17x128xf32, #tpu.memory_space<vmem>>, vector<17x128xf32>
    %cst_5 = arith.constant dense<0.000000e+00> : vector<8x128xf32>
    %16 = tpu.matmul %14, %15, %cst_5 {dimension_numbers = #tpu.dot_dimension_numbers<[1], [0], [0], [1], [0, 0, 1, 1], [], []>} : vector<8x17xf32>, vector<17x128xf32>, vector<8x128xf32> -> vector<8x128xf32>
    %17 = arith.addf %8, %16 : vector<8x128xf32>
    %18 = vector.extract_strided_slice %0 {offsets = [0, 4], sizes = [8, 1], strides = [1, 1]} : vector<8x5xi32> to vector<8x1xi32>
    %19 = tpu.iota {dimensions = array<i32: 1>} : vector<8x17xi32>
    %20 = vector.broadcast %18 : vector<8x1xi32> to vector<8x17xi32>
    %21 = arith.cmpi eq, %20, %19 : vector<8x17xi32>
    %22 = arith.extui %21 : vector<8x17xi1> to vector<8x17xi32>
    %23 = arith.sitofp %22 : vector<8x17xi32> to vector<8x17xf32>
    %c0_6 = arith.constant 0 : index
    %c0_7 = arith.constant 0 : index
    %24 = vector.load %arg5[%c0_6, %c0_7] : memref<17x128xf32, #tpu.memory_space<vmem>>, vector<17x128xf32>
    %cst_8 = arith.constant dense<0.000000e+00> : vector<8x128xf32>
    %25 = tpu.matmul %23, %24, %cst_8 {dimension_numbers = #tpu.dot_dimension_numbers<[1], [0], [0], [1], [0, 0, 1, 1], [], []>} : vector<8x17xf32>, vector<17x128xf32>, vector<8x128xf32> -> vector<8x128xf32>
    %26 = arith.addf %17, %25 : vector<8x128xf32>
    %27 = vector.extract_strided_slice %0 {offsets = [0, 1], sizes = [8, 1], strides = [1, 1]} : vector<8x5xi32> to vector<8x1xi32>
    %28 = tpu.iota {dimensions = array<i32: 1>} : vector<8x17xi32>
    %29 = vector.broadcast %27 : vector<8x1xi32> to vector<8x17xi32>
    %30 = arith.cmpi eq, %29, %28 : vector<8x17xi32>
    %31 = arith.extui %30 : vector<8x17xi1> to vector<8x17xi32>
    %32 = arith.sitofp %31 : vector<8x17xi32> to vector<8x17xf32>
    %c0_9 = arith.constant 0 : index
    %c0_10 = arith.constant 0 : index
    %33 = vector.load %arg3[%c0_9, %c0_10] : memref<17x128xf32, #tpu.memory_space<vmem>>, vector<17x128xf32>
    %cst_11 = arith.constant dense<0.000000e+00> : vector<8x128xf32>
    %34 = tpu.matmul %32, %33, %cst_11 {dimension_numbers = #tpu.dot_dimension_numbers<[1], [0], [0], [1], [0, 0, 1, 1], [], []>} : vector<8x17xf32>, vector<17x128xf32>, vector<8x128xf32> -> vector<8x128xf32>
    %35 = arith.addf %26, %34 : vector<8x128xf32>
    %36 = vector.extract_strided_slice %0 {offsets = [0, 2], sizes = [8, 1], strides = [1, 1]} : vector<8x5xi32> to vector<8x1xi32>
    %37 = tpu.iota {dimensions = array<i32: 1>} : vector<8x17xi32>
    %38 = vector.broadcast %36 : vector<8x1xi32> to vector<8x17xi32>
    %39 = arith.cmpi eq, %38, %37 : vector<8x17xi32>
    %40 = arith.extui %39 : vector<8x17xi1> to vector<8x17xi32>
    %41 = arith.sitofp %40 : vector<8x17xi32> to vector<8x17xf32>
    %c0_12 = arith.constant 0 : index
    %c0_13 = arith.constant 0 : index
    %42 = vector.load %arg3[%c0_12, %c0_13] : memref<17x128xf32, #tpu.memory_space<vmem>>, vector<17x128xf32>
    %cst_14 = arith.constant dense<0.000000e+00> : vector<8x128xf32>
    %43 = tpu.matmul %41, %42, %cst_14 {dimension_numbers = #tpu.dot_dimension_numbers<[1], [0], [0], [1], [0, 0, 1, 1], [], []>} : vector<8x17xf32>, vector<17x128xf32>, vector<8x128xf32> -> vector<8x128xf32>
    %44 = arith.addf %26, %43 : vector<8x128xf32>
    %45 = tpu.concatenate %35, %44 in 0 : vector<8x128xf32>, vector<8x128xf32> -> vector<16x128xf32>
    %cst_15 = arith.constant 0.000000e+00 : f32
    %46 = vector.broadcast %cst_15 : f32 to vector<16x128xf32>
    %47 = arith.maximumf %45, %46 : vector<16x128xf32>
    %c0_16 = arith.constant 0 : index
    %c0_17 = arith.constant 0 : index
    %c0_18 = arith.constant 0 : index
    %48 = vector.load %arg6[%c0_16, %c0_17, %c0_18] : memref<1x128x128xf32, #tpu.memory_space<vmem>>, vector<1x128x128xf32>
    %49 = vector.shape_cast %48 : vector<1x128x128xf32> to vector<128x128xf32>
    %cst_19 = arith.constant dense<0.000000e+00> : vector<16x128xf32>
    %50 = tpu.matmul %47, %49, %cst_19 {dimension_numbers = #tpu.dot_dimension_numbers<[1], [0], [0], [1], [0, 0, 1, 1], [], []>} : vector<16x128xf32>, vector<128x128xf32>, vector<16x128xf32> -> vector<16x128xf32>
    %c0_20 = arith.constant 0 : index
    %c0_21 = arith.constant 0 : index
    %c0_22 = arith.constant 0 : index
    %51 = vector.load %arg7[%c0_20, %c0_21, %c0_22] : memref<1x1x128xf32, #tpu.memory_space<vmem>>, vector<1x1x128xf32>
    %52 = vector.shape_cast %51 : vector<1x1x128xf32> to vector<1x128xf32>
    %53 = vector.broadcast %52 : vector<1x128xf32> to vector<16x128xf32>
    %54 = arith.addf %50, %53 : vector<16x128xf32>
    %cst_23 = arith.constant 0.000000e+00 : f32
    %55 = vector.broadcast %cst_23 : f32 to vector<16x128xf32>
    %56 = arith.maximumf %54, %55 : vector<16x128xf32>
    %57 = vector.extract_strided_slice %56 {offsets = [0, 0], sizes = [8, 128], strides = [1, 1]} : vector<16x128xf32> to vector<8x128xf32>
    %c0_24 = arith.constant 0 : index
    %c0_25 = arith.constant 0 : index
    %58 = vector.load %arg8[%c0_24, %c0_25] : memref<1x128xf32, #tpu.memory_space<vmem>>, vector<1x128xf32>
    %59 = vector.broadcast %58 : vector<1x128xf32> to vector<8x128xf32>
    %60 = arith.mulf %57, %59 : vector<8x128xf32>
    %61 = tpu.transpose %60, [1, 0] : vector<8x128xf32> -> vector<128x8xf32>
    %cst_26 = arith.constant dense<0.000000e+00> : vector<8xf32>
    %62 = vector.multi_reduction <add>, %61, %cst_26 [0] : vector<128x8xf32> to vector<8xf32>
    %63 = vector.shape_cast %62 : vector<8xf32> to vector<1x8xf32>
    %c0_27 = arith.constant 0 : index
    %c0_28 = arith.constant 0 : index
    %64 = vector.load %arg9[%c0_27, %c0_28] : memref<1x1xf32, #tpu.memory_space<vmem>>, vector<1x1xf32>
    %65 = vector.broadcast %64 : vector<1x1xf32> to vector<1x8xf32>
    %66 = arith.addf %63, %65 : vector<1x8xf32>
    %cst_29 = arith.constant 0.000000e+00 : f32
    %67 = vector.broadcast %cst_29 : f32 to vector<1x8xf32>
    %68 = arith.subf %67, %66 : vector<1x8xf32>
    %69 = math.exp %68 : vector<1x8xf32>
    %cst_30 = arith.constant 1.000000e+00 : f32
    %70 = vector.broadcast %cst_30 : f32 to vector<1x8xf32>
    %71 = arith.addf %70, %69 : vector<1x8xf32>
    %72 = tpu.reciprocal %71 : vector<1x8xf32> -> vector<1x8xf32>
    %73 = vector.extract_strided_slice %56 {offsets = [8, 0], sizes = [8, 128], strides = [1, 1]} : vector<16x128xf32> to vector<8x128xf32>
    %c0_31 = arith.constant 0 : index
    %c0_32 = arith.constant 0 : index
    %74 = vector.load %arg8[%c0_31, %c0_32] : memref<1x128xf32, #tpu.memory_space<vmem>>, vector<1x128xf32>
    %75 = vector.broadcast %74 : vector<1x128xf32> to vector<8x128xf32>
    %76 = arith.mulf %73, %75 : vector<8x128xf32>
    %77 = tpu.transpose %76, [1, 0] : vector<8x128xf32> -> vector<128x8xf32>
    %cst_33 = arith.constant dense<0.000000e+00> : vector<8xf32>
    %78 = vector.multi_reduction <add>, %77, %cst_33 [0] : vector<128x8xf32> to vector<8xf32>
    %79 = vector.shape_cast %78 : vector<8xf32> to vector<1x8xf32>
    %c0_34 = arith.constant 0 : index
    %c0_35 = arith.constant 0 : index
    %80 = vector.load %arg9[%c0_34, %c0_35] : memref<1x1xf32, #tpu.memory_space<vmem>>, vector<1x1xf32>
    %81 = vector.broadcast %80 : vector<1x1xf32> to vector<1x8xf32>
    %82 = arith.addf %79, %81 : vector<1x8xf32>
    %cst_36 = arith.constant 0.000000e+00 : f32
    %83 = vector.broadcast %cst_36 : f32 to vector<1x8xf32>
    %84 = arith.subf %83, %82 : vector<1x8xf32>
    %85 = math.exp %84 : vector<1x8xf32>
    %cst_37 = arith.constant 1.000000e+00 : f32
    %86 = vector.broadcast %cst_37 : f32 to vector<1x8xf32>
    %87 = arith.addf %86, %85 : vector<1x8xf32>
    %88 = tpu.reciprocal %87 : vector<1x8xf32> -> vector<1x8xf32>
    %89 = arith.subf %72, %88 : vector<1x8xf32>
    %c0_38 = arith.constant 0 : index
    %c0_39 = arith.constant 0 : index
    %90 = vector.load %arg10[%c0_38, %c0_39] : memref<1x8xf32, #tpu.memory_space<vmem>>, vector<1x8xf32>
    tpu.vector_store %arg10[%c0_38, %c0_39], %89 {strides = array<i32>} : memref<1x8xf32, #tpu.memory_space<vmem>>, vector<1x8xf32>,
    return
  }
  func.func @transform_0(%arg0: i32) -> (i32, i32) {
    %c0_i32 = arith.constant 0 : i32
    %c0_i32_0 = arith.constant 0 : i32
    return %arg0, %c0_i32 : i32, i32
  }
  func.func @transform_1(%arg0: i32) -> (i32, i32) {
    %c0_i32 = arith.constant 0 : i32
    %c0_i32_0 = arith.constant 0 : i32
    %c0_i32_1 = arith.constant 0 : i32
    return %c0_i32, %c0_i32_0 : i32, i32
  }
  func.func @transform_2(%arg0: i32) -> (i32, i32) {
    %c0_i32 = arith.constant 0 : i32
    %c0_i32_0 = arith.constant 0 : i32
    %c0_i32_1 = arith.constant 0 : i32
    return %c0_i32, %c0_i32_0 : i32, i32
  }
  func.func @transform_3(%arg0: i32) -> (i32, i32) {
    %c0_i32 = arith.constant 0 : i32
    %c0_i32_0 = arith.constant 0 : i32
    %c0_i32_1 = arith.constant 0 : i32
    return %c0_i32, %c0_i32_0 : i32, i32
  }
  func.func @transform_4(%arg0: i32) -> (i32, i32) {
    %c0_i32 = arith.constant 0 : i32
    %c0_i32_0 = arith.constant 0 : i32
    %c0_i32_1 = arith.constant 0 : i32
    return %c0_i32, %c0_i32_0 : i32, i32
  }
  func.func @transform_5(%arg0: i32) -> (i32, i32, i32) {
    %c0_i32 = arith.constant 0 : i32
    %c0_i32_0 = arith.constant 0 : i32
    %c0_i32_1 = arith.constant 0 : i32
    %c0_i32_2 = arith.constant 0 : i32
    return %c0_i32, %c0_i32_0, %c0_i32_1 : i32, i32, i32
  }
  func.func @transform_6(%arg0: i32) -> (i32, i32, i32) {
    %c0_i32 = arith.constant 0 : i32
    %c0_i32_0 = arith.constant 0 : i32
    %c0_i32_1 = arith.constant 0 : i32
    %c0_i32_2 = arith.constant 0 : i32
    return %c0_i32, %c0_i32_0, %c0_i32_1 : i32, i32, i32
  }
  func.func @transform_7(%arg0: i32) -> (i32, i32) {
    %c0_i32 = arith.constant 0 : i32
    %c0_i32_0 = arith.constant 0 : i32
    %c0_i32_1 = arith.constant 0 : i32
    return %c0_i32, %c0_i32_0 : i32, i32
  }
  func.func @transform_8(%arg0: i32) -> (i32, i32) {
    %c0_i32 = arith.constant 0 : i32
    %c0_i32_0 = arith.constant 0 : i32
    %c0_i32_1 = arith.constant 0 : i32
    return %c0_i32, %c0_i32_0 : i32, i32
  }
  func.func @transform_9(%arg0: i32) -> (i32, i32) {
    %c0_i32 = arith.constant 0 : i32
    %c0_i32_0 = arith.constant 0 : i32
    return %c0_i32, %arg0 : i32, i32
  }
}

</mosaic_0001>

<bundles_post_ra>
// kernel: tpu_custom_call.1
= control target key start
LH: loop header
LB: loop body
LE: loop exit
PB: predicated region body
PF: predicated region fallthrough
CT: control target
= control target key end

     0   :  { %s928_s0 = inlined_call_operand.hbm [shape: s32[8,5], index: 0, kind: input, shape index: {}]   ;;  %s929_s1 = inlined_call_operand.hbm [shape: f32[8,128], index: 1, kind: input, shape index: {}]   ;;  %s930_s2 = inlined_call_operand.hbm [shape: f32[17,128], index: 2, kind: input, shape index: {}]   ;;  %s931_s3 = inlined_call_operand.hbm [shape: f32[17,128], index: 3, kind: input, shape index: {}]   ;;  %s932_s4 = inlined_call_operand.hbm [shape: f32[17,128], index: 4, kind: input, shape index: {}]   ;;  %s933_s5 = inlined_call_operand.hbm [shape: f32[1,128,128], index: 5, kind: input, shape index: {}]   ;;  %s934_s6 = inlined_call_operand.vmem [shape: f32[1,1,128], index: 6, kind: input, shape index: {}]   ;;  %s935_s7 = inlined_call_operand.vmem [shape: f32[1,128], index: 7, kind: input, shape index: {}]   ;;  %s936_s8 = inlined_call_operand.<no memory space> [shape: f32[1,1], index: 8, kind: input, shape index: {}]   ;;  %s937_s9 = inlined_call_operand.hbm [shape: f32[1,8], index: 9, kind: output, shape index: {}]  }
   0x1   :  { %v14_v0 = vstv %s936_s8 }
   0x2   :  { %15 = vst [vmem:[#allocation2] sm:$0x1] %v14_v0 }
   0x3   :  { %16 = vsyncpa [#allocation4], 0 }
   0x4   :  { %17 = vsyncpa [#allocation7], 0 }
   0x5   :  { %18 = vsyncpa [#allocation10], 0 }
   0x6   :  { %19 = vsyncpa [#allocation13], 0  ;;  %s37_s13 = sshll.u32 %s929_s1, 4  ;;  %s38_s13 = int_to_ptr.hbm [resolvable:$true] %s37_s13 }
   0x7   :  { %20 = vsyncpa [#allocation5], 0  ;;  %s796_s14 = smov [#allocation6]   ;;  %s60_s18 = sshll.u32 %s931_s3, 4  ;;  %s61_s18 = int_to_ptr.hbm [resolvable:$true] %s60_s18 }
   0x8   :  { %s39_s15 = sshll.u32 %s796_s14, 4  ;;  %s797_s8 = smov [#allocation9]   ;;  %s40_s15 = int_to_ptr.vmem [resolvable:$true] %s39_s15 }
   0x9   :  { %42 = dma.hbm_to_vmem [thread:$0]  %s38_s13, 128, %s40_s15, [#allocation7]  }
   0xa   :  { %s62_s19 = sshll.u32 %s797_s8, 4  ;;  %s26_s22 = sshll.u32 %s928_s0, 4  ;;  %s63_s19 = int_to_ptr.vmem [resolvable:$true] %s62_s19  ;;  %s27_s22 = int_to_ptr.hbm [resolvable:$true] %s26_s22 }
   0xb   :  { %s798_s1 = smov 128   ;;  %s799_s23 = smov 8  }
   0xc   :  { %68 = dma.hbm_to_vmem [thread:$0]  %s61_s18, 384, %s63_s19, [#allocation10], %s798_s1, %s798_s1, %s799_s23  }
   0xd   :  { %s47_s26 = sshll.u32 %s930_s2, 4  ;;  %s800_s27 = smov [#allocation3]   ;;  %s48_s26 = int_to_ptr.hbm [resolvable:$true] %s47_s26 }
   0xe   :  { %s28_s28 = sshll.u32 %s800_s27, 4  ;;  %s801_s3 = smov [#allocation8]   ;;  %s29_s28 = int_to_ptr.vmem [resolvable:$true] %s28_s28 }
   0xf   :  { %31 = dma.hbm_to_vmem [thread:$0]  %s27_s22, 128, %s29_s28, [#allocation4]  }
  0x10   :  { %s49_s29 = sshll.u32 %s801_s3, 4  ;;  %s73_s0 = sshll.u32 %s932_s4, 4  ;;  %s50_s29 = int_to_ptr.vmem [resolvable:$true] %s49_s29  ;;  %s74_s0 = int_to_ptr.hbm [resolvable:$true] %s73_s0 }
  0x11   :  { %55 = dma.hbm_to_vmem [thread:$0]  %s48_s26, 384, %s50_s29, [#allocation7], %s798_s1, %s798_s1, %s799_s23  }
  0x12   :  { %s86_s13 = sshll.u32 %s933_s5, 4  ;;  %s802_s14 = smov [#allocation11]   ;;  %s87_s13 = int_to_ptr.hbm [resolvable:$true] %s86_s13 }
  0x13   :  { %s75_s2 = sshll.u32 %s802_s14, 4  ;;  %s803_s15 = smov [#allocation12]   ;;  %s76_s2 = int_to_ptr.vmem [resolvable:$true] %s75_s2 }
  0x14   :  { %81 = dma.hbm_to_vmem [thread:$0]  %s74_s0, 384, %s76_s2, [#allocation10], %s798_s1, %s798_s1, %s799_s23  }
  0x15   :  { %s88_s16 = sshll.u32 %s803_s15, 4  ;;  %s89_s16 = int_to_ptr.vmem [resolvable:$true] %s88_s16 }
  0x16   :  { %94 = dma.hbm_to_vmem [thread:$0]  %s87_s13, 2048, %s89_s16, [#allocation13], %s798_s1, %s798_s1, %s799_s23  }
  0x17   :  { %786 = dma.done.wait [#allocation4], 128  }
  0x18   :  { %787 = vsyncadd [#allocation4], 4294967168 }
  0x19   :  { %788 = dma.done.wait [#allocation7], 512  }
  0x1a   :  { %789 = vsyncadd [#allocation7], 4294966784 }
  0x1b   :  { %790 = dma.done.wait [#allocation10], 768  }
  0x1c   :  { %791 = vsyncadd [#allocation10], 4294966528 }
  0x1d   :  { %792 = dma.done.wait [#allocation13], 2048  }
  0x1e   :  { %793 = vsyncadd [#allocation13], 4294965248  ;;  %v804_v1 = vmov 0   ;;  %v805_v2 = vmov 4   ;;  %v806_v3 = vmov 2   ;;  %v125_v4 = vld [vmem:[#allocation3] sm:$0xff]  ;;  %v126_v21 = vlaneseq }
  0x1f   :  { %602 = vset.pattern.permute.xlu0 %v804_v1  ;;  %604 = vset.pattern.permute.xlu1 %v805_v2  ;;  %v807_v5 = vmov 3   ;;  %v808_v6 = vmov 1   ;;  %v134_v7 = vld [vmem:[#allocation6] sm:$0xff]  ;;  %vm148_vm0 = vcmask 1040384   ;;  %v204_v8 = vld [vmem:[#allocation11 + $0x10] sm:$0x1] }
  0x20   :  { %606 = vset.pattern.permute.xlu2 %v806_v3  ;;  %129 = vperm.xlu0 %602, %v125_v4   ;;  %v143_v9 = vld [vmem:[#allocation9 + $0x10] sm:$0x1]  ;;  %v142_v10 = vld [vmem:[#allocation9 + $0x8] sm:$0xff]  ;;  %v203_v11 = vld [vmem:[#allocation11 + $0x8] sm:$0xff]  ;;  %v127_v22 = vand.u32 127, %v126_v21  ;;  %vm172_vm1 = vcmask 64512  }
  0x21   :  { %197 = vperm.xlu1 %604, %v125_v4   ;;  %269 = vperm.xlu2 %606, %v125_v4   ;;  %v141_v12 = vld [vmem:[#allocation9] sm:$0xff]  ;;  %v202_v13 = vld [vmem:[#allocation11] sm:$0xff]  ;;  %v239_v15 = vld [vmem:[#allocation8 + $0x8] sm:$0xff]  ;;  %v809_v25 = vmov 0.0   ;;  %vm144_vm4 = vcmask 138240   ;;  %s544_s20 = sshll.u32 %s937_s9, 4  ;;  %s545_s20 = int_to_ptr.hbm [resolvable:$true] %s544_s20 }
  0x22   :  { %191 = vmatpush.msra.mxu1 %v134_v7  ;;  %559 = vmatpush.msk.msra.mxu3 %vm148_vm0, %v143_v9  ;;  %v240_v14 = vld [vmem:[#allocation8 + $0x10] sm:$0x1]  ;;  %v238_v16 = vld [vmem:[#allocation8] sm:$0xff]  ;;  %v314_v18 = vld [vmem:[#allocation12 + $0x70] sm:$0xff] }
  0x23   :  { %v315_v17 = vld [vmem:[#allocation12 + $0x78] sm:$0xff]  ;;  %v313_v19 = vld [vmem:[#allocation12 + $0x68] sm:$0xff]  ;;  %v312_v20 = vld [vmem:[#allocation12 + $0x60] sm:$0xff] }
  0x24   :  { %563 = vmatpush.msk.msrb.mxu1 %vm148_vm0, %v204_v8  ;;  %166 = vmatpush.msra.mxu3 %v142_v10  ;;  %v311_v34 = vld [vmem:[#allocation12 + $0x58] sm:$0xff]  ;;  %v310_v35 = vld [vmem:[#allocation12 + $0x50] sm:$0xff]  ;;  %v309_v36 = vld [vmem:[#allocation12 + $0x48] sm:$0xff] }
  0x25   :  { %571 = vmatpush.msra.mxu2 %v315_v17  ;;  %320 = vmatpush.msra.mxu0 %v315_v17  ;;  %v308_v37 = vld [vmem:[#allocation12 + $0x40] sm:$0xff]  ;;  %v307_v38 = vld [vmem:[#allocation12 + $0x38] sm:$0xff]  ;;  %v306_v39 = vld [vmem:[#allocation12 + $0x30] sm:$0xff] }
  0x26   :  { %225 = vmatpush.msrb.mxu1 %v203_v11  ;;  %167 = vmatpush.msra.mxu3 %v141_v12  ;;  %v305_v40 = vld [vmem:[#allocation12 + $0x28] sm:$0xff]  ;;  %v304_v41 = vld [vmem:[#allocation12 + $0x20] sm:$0xff]  ;;  %v303_v42 = vld [vmem:[#allocation12 + $0x18] sm:$0xff] }
  0x27   :  { %572 = vmatpush.msra.mxu2 %v314_v18  ;;  %321 = vmatpush.msra.mxu0 %v314_v18  ;;  %v302_v43 = vld [vmem:[#allocation12 + $0x10] sm:$0xff]  ;;  %v301_v44 = vld [vmem:[#allocation12 + $0x8] sm:$0xff]  ;;  %v300_v45 = vld [vmem:[#allocation12] sm:$0xff] }
  0x28   :  { %603 = vset.pattern.permute.xlu0 %v807_v5  ;;  %226 = vmatpush.msrb.mxu1 %v202_v13  ;;  %v608_v57 = vld [vmem:[%s934_s6] ss:$0 sm:$0xff]  ;;  %s810_s6 = smov [#allocation14]  }
  0x29   :  { %605 = vset.pattern.permute.xlu1 %v808_v6  ;;  %136 = vperm.xlu0 %603, %v125_v4   ;;  %v609_v60 = vld [vmem:[%s935_s7] ss:$0 sm:$0xff]  ;;  %s542_s7 = sshll.u32 %s810_s6, 4  ;;  %s543_s7 = int_to_ptr.vmem [resolvable:$true] %s542_s7 }
  0x2a   :  { %233 = vperm.xlu1 %605, %v125_v4   ;;  %566 = vmatpush.msk.msrb.mxu3 %vm148_vm0, %v240_v14  ;;  %v419_v3 = vld [vmem:[#allocation2] sm:$0x1] }
  0x2b   :  { %573 = vmatpush.msra.mxu2 %v313_v19  ;;  %322 = vmatpush.msra.mxu0 %v313_v19 }
  0x2c   :  { %261 = vmatpush.msrb.mxu3 %v239_v15 }
  0x2d   :  { %574 = vmatpush.msra.mxu2 %v312_v20  ;;  %323 = vmatpush.msra.mxu0 %v312_v20 }
  0x2e   :  { %262 = vmatpush.msrb.mxu3 %v238_v16 }
  0x2f   :  { %575 = vmatpush.msra.mxu2 %v311_v34  ;;  %324 = vmatpush.msra.mxu0 %v311_v34 }
  0x31   :  { %607 = vset.pattern.permute.xlu0 %v804_v1  ;;  %576 = vmatpush.msra.mxu2 %v310_v35 }
  0x32   :  { %325 = vmatpush.msra.mxu0 %v310_v35  ;;  %422 = vperm.xlu0 %607, %v419_v3  }
  0x33   :  { %577 = vmatpush.msra.mxu2 %v309_v36 }
  0x34   :  { %326 = vmatpush.msra.mxu0 %v309_v36 }
  0x35   :  { %578 = vmatpush.msra.mxu2 %v308_v37 }
  0x36   :  { %327 = vmatpush.msra.mxu0 %v308_v37 }
  0x37   :  { %579 = vmatpush.msra.mxu2 %v307_v38 }
  0x38   :  { %328 = vmatpush.msra.mxu0 %v307_v38 }
  0x39   :  { %580 = vmatpush.msra.mxu2 %v306_v39 }
  0x3a   :  { %329 = vmatpush.msra.mxu0 %v306_v39 }
  0x3b   :  { %581 = vmatpush.msra.mxu2 %v305_v40 }
  0x3c   :  { %330 = vmatpush.msra.mxu0 %v305_v40 }
  0x3d   :  { %582 = vmatpush.msra.mxu2 %v304_v41 }
  0x3e   :  { %331 = vmatpush.msra.mxu0 %v304_v41 }
  0x3f   :  { %583 = vmatpush.msra.mxu2 %v303_v42 }
  0x40   :  { %332 = vmatpush.msra.mxu0 %v303_v42 }
  0x41   :  { %584 = vmatpush.msra.mxu2 %v302_v43 }
  0x42   :  { %333 = vmatpush.msra.mxu0 %v302_v43 }
  0x43   :  { %585 = vmatpush.msra.mxu2 %v301_v44 }
  0x44   :  { %334 = vmatpush.msra.mxu0 %v301_v44 }
  0x45   :  { %586 = vmatpush.msra.mxu2 %v300_v45 }
  0x46   :  { %335 = vmatpush.msra.mxu0 %v300_v45 }
  0x7b   :  { %v270_v29 = vpop.permute.xlu2 %269 }
  0x7c   :  { %vm271_vm6 = vcmp.eq.s32.totalorder %v270_v29, %v127_v22 }
  0x7d   :  { %v568_v32 = vsel %vm271_vm6, 1.0, %v809_v25 }
  0x92   :  { %v130_v23 = vpop.permute.xlu0 %129 }
  0x93   :  { %vm131_vm2 = vcmp.eq.s32.totalorder %v130_v23, %v127_v22  ;;  %v198_v24 = vpop.permute.xlu1 %197 }
  0x94   :  { %v557_v26 = vsel %vm131_vm2, 1.0, %v809_v25  ;;  %vm199_vm3 = vcmp.eq.s32.totalorder %v198_v24, %v127_v22 }
  0x95   :  { %561 = vmatmul.msk.f32.vlgmr.msra.gmra.mxu1 %vm172_vm1, %v557_v26  ;;  %v562_v27 = vsel %vm199_vm3, 1.0, %v809_v25 }
  0x96   :  { %569 = vmatpush.msk.msra.mxu1 %vm148_vm0, %v240_v14  ;;  %vm535_vm0 = vcmask 57344  }
  0x98   :  { %291 = vmatpush.msra.mxu1 %v239_v15 }
  0x9a   :  { %292 = vmatpush.msra.mxu1 %v238_v16 }
  0x9b   :  { %v137_v28 = vpop.permute.xlu0 %136 }
  0x9c   :  { %vm138_vm5 = vcmp.eq.s32.totalorder %v137_v28, %v127_v22  ;;  %v234_v31 = vpop.permute.xlu1 %233 }
  0x9d   :  { %v558_v30 = vsel %vm138_vm5, 1.0, %v809_v25  ;;  %564 = vmatmul.msk.f32.vlgmr.msrb.gmra.mxu1 %vm144_vm4, %v562_v27  ;;  %vm235_vm7 = vcmp.eq.s32.totalorder %v234_v31, %v127_v22 }
  0x9e   :  { %560 = vmatmul.msk.f32.vlgmr.msra.gmra.mxu3 %vm144_vm4, %v558_v30  ;;  %v565_v33 = vsel %vm235_vm7, 1.0, %v809_v25 }
  0xa5   :  { %570 = vmatmul.msk.f32.vlgmr.msra.gmra.mxu1 %vm144_vm4, %v568_v32 }
  0xa6   :  { %567 = vmatmul.msk.f32.vlgmr.msrb.gmra.mxu3 %vm144_vm4, %v565_v33 }
 0x112   :  { %v193_v46 = vpop.f32.mrf.mxu1 }
 0x11a   :  { %v228_v47 = vpop.f32.mrf.mxu1 }
 0x121   :  { %v169_v48 = vpop.f32.mrf.mxu3 }
 0x122   :  { %v194_v49 = vadd.f32 %v193_v46, %v169_v48  ;;  %v294_v50 = vpop.f32.mrf.mxu1 }
 0x124   :  { %v231_v51 = vadd.f32 %v228_v47, %v194_v49 }
 0x126   :  { %v297_v52 = vadd.f32 %v294_v50, %v231_v51 }
 0x128   :  { %v299_v53 = vmax.f32 %v297_v52, 0.0 }
 0x129   :  { %v264_v54 = vpop.f32.mrf.mxu3 }
 0x12a   :  { %v267_v55 = vadd.f32 %v264_v54, %v231_v51  ;;  %339 = vmatmul.f32.vlgmr.msra.gmra.mxu2 %v299_v53 }
 0x12c   :  { %v298_v56 = vmax.f32 %v267_v55, 0.0 }
 0x12e   :  { %336 = vmatmul.f32.vlgmr.msra.gmra.mxu0 %v298_v56 }
 0x1ab   :  { %v337_v58 = vpop.f32.mrf.mxu0 }
 0x1ac   :  { %v338_v59 = vadd.f32 %v608_v57, %v337_v58 }
 0x1ad   :  { %v340_v61 = vpop.f32.mrf.mxu2 }
 0x1ae   :  { %v343_v62 = vmax.f32 %v338_v59, 0.0  ;;  %v341_v63 = vadd.f32 %v608_v57, %v340_v61 }
 0x1b0   :  { %v349_v0 = vmul.f32 %v609_v60, %v343_v62  ;;  %v344_v1 = vmax.f32 %v341_v63, 0.0 }
 0x1b2   :  { %v445_v2 = vmul.f32 %v609_v60, %v344_v1  ;;  %350 = vxpose.xlu2.b32.start.end [1/1] (short) %v349_v0, 128 }
 0x1b4   :  { %446 = vxpose.xlu1.b32.start.end [1/1] (short) %v445_v2, 128 }
 0x24b   :  { %v366_v4 = vpop.trf.xlu2 }
 0x24c   :  { %v382_v5 = vsel %vm172_vm1, %v366_v4, 0.0 }
 0x253   :  { %v367_v6 = vpop.trf.xlu2 }
 0x254   :  { %v383_v7 = vsel %vm172_vm1, %v367_v6, 0.0 }
 0x255   :  { %v384_v8 = vadd.f32 %v383_v7, %v382_v5 }
 0x258   :  { %v462_v9 = vpop.trf.xlu1 }
 0x259   :  { %v478_v14 = vsel %vm172_vm1, %v462_v9, 0.0 }
 0x25b   :  { %v368_v10 = vpop.trf.xlu2 }
 0x25c   :  { %v385_v11 = vsel %vm172_vm1, %v368_v10, 0.0 }
 0x25d   :  { %v386_v12 = vadd.f32 %v385_v11, %v384_v8 }
 0x260   :  { %v463_v13 = vpop.trf.xlu1 }
 0x261   :  { %v479_v15 = vsel %vm172_vm1, %v463_v13, 0.0 }
 0x262   :  { %v480_v16 = vadd.f32 %v479_v15, %v478_v14 }
 0x263   :  { %v369_v17 = vpop.trf.xlu2 }
 0x264   :  { %v387_v18 = vsel %vm172_vm1, %v369_v17, 0.0 }
 0x265   :  { %v388_v19 = vadd.f32 %v387_v18, %v386_v12 }
 0x268   :  { %v464_v20 = vpop.trf.xlu1 }
 0x269   :  { %v481_v21 = vsel %vm172_vm1, %v464_v20, 0.0 }
 0x26a   :  { %v482_v22 = vadd.f32 %v481_v21, %v480_v16 }
 0x26b   :  { %v370_v23 = vpop.trf.xlu2 }
 0x26c   :  { %v389_v24 = vsel %vm172_vm1, %v370_v23, 0.0 }
 0x26d   :  { %v390_v25 = vadd.f32 %v389_v24, %v388_v19 }
 0x270   :  { %v465_v26 = vpop.trf.xlu1 }
 0x271   :  { %v483_v27 = vsel %vm172_vm1, %v465_v26, 0.0 }
 0x272   :  { %v484_v28 = vadd.f32 %v483_v27, %v482_v22 }
 0x273   :  { %v371_v29 = vpop.trf.xlu2 }
 0x274   :  { %v391_v46 = vsel %vm172_vm1, %v371_v29, 0.0 }
 0x275   :  { %v392_v49 = vadd.f32 %v391_v46, %v390_v25 }
 0x278   :  { %v466_v30 = vpop.trf.xlu1 }
 0x279   :  { %v485_v31 = vsel %vm172_vm1, %v466_v30, 0.0 }
 0x27a   :  { %v486_v32 = vadd.f32 %v485_v31, %v484_v28  ;;  %v423_v31 = vpop.permute.xlu0 %422 }
 0x27b   :  { %v372_v33 = vpop.trf.xlu2 }
 0x27c   :  { %v393_v47 = vsel %vm172_vm1, %v372_v33, 0.0 }
 0x27d   :  { %v394_v51 = vadd.f32 %v393_v47, %v392_v49 }
 0x280   :  { %v467_v34 = vpop.trf.xlu1 }
 0x281   :  { %v487_v61 = vsel %vm172_vm1, %v467_v34, 0.0 }
 0x282   :  { %v488_v3 = vadd.f32 %v487_v61, %v486_v32 }
 0x283   :  { %v373_v35 = vpop.trf.xlu2 }
 0x284   :  { %v395_v50 = vsel %vm172_vm1, %v373_v35, 0.0 }
 0x285   :  { %v396_v54 = vadd.f32 %v395_v50, %v394_v51 }
 0x288   :  { %v468_v36 = vpop.trf.xlu1 }
 0x289   :  { %v489_v1 = vsel %vm172_vm1, %v468_v36, 0.0  ;;  %v425_v36 = vperm.slane %v423_v31, 0 }
 0x28a   :  { %v490_v7 = vadd.f32 %v489_v1, %v488_v3 }
 0x28b   :  { %v374_v37 = vpop.trf.xlu2 }
 0x28c   :  { %v397_v53 = vsel %vm172_vm1, %v374_v37, 0.0 }
 0x28d   :  { %v398_v56 = vadd.f32 %v397_v53, %v396_v54 }
 0x290   :  { %v469_v38 = vpop.trf.xlu1 }
 0x291   :  { %v491_v5 = vsel %vm172_vm1, %v469_v38, 0.0 }
 0x292   :  { %v492_v12 = vadd.f32 %v491_v5, %v490_v7 }
 0x293   :  { %v375_v39 = vpop.trf.xlu2 }
 0x294   :  { %v399_v55 = vsel %vm172_vm1, %v375_v39, 0.0 }
 0x295   :  { %v400_v59 = vadd.f32 %v399_v55, %v398_v56 }
 0x298   :  { %v470_v40 = vpop.trf.xlu1 }
 0x299   :  { %v493_v10 = vsel %vm172_vm1, %v470_v40, 0.0 }
 0x29a   :  { %v494_v16 = vadd.f32 %v493_v10, %v492_v12 }
 0x29b   :  { %v376_v41 = vpop.trf.xlu2 }
 0x29c   :  { %v401_v57 = vsel %vm172_vm1, %v376_v41, 0.0 }
 0x29d   :  { %v402_v62 = vadd.f32 %v401_v57, %v400_v59 }
 0x2a0   :  { %v471_v42 = vpop.trf.xlu1 }
 0x2a1   :  { %v495_v13 = vsel %vm172_vm1, %v471_v42, 0.0 }
 0x2a2   :  { %v496_v20 = vadd.f32 %v495_v13, %v494_v16 }
 0x2a3   :  { %v377_v43 = vpop.trf.xlu2 }
 0x2a4   :  { %v403_v60 = vsel %vm172_vm1, %v377_v43, 0.0 }
 0x2a5   :  { %v404_v2 = vadd.f32 %v403_v60, %v402_v62 }
 0x2a8   :  { %v472_v44 = vpop.trf.xlu1 }
 0x2a9   :  { %v497_v18 = vsel %vm172_vm1, %v472_v44, 0.0 }
 0x2aa   :  { %v498_v23 = vadd.f32 %v497_v18, %v496_v20 }
 0x2ab   :  { %v378_v45 = vpop.trf.xlu2 }
 0x2ac   :  { %v405_v0 = vsel %vm172_vm1, %v378_v45, 0.0 }
 0x2ad   :  { %v406_v6 = vadd.f32 %v405_v0, %v404_v2 }
 0x2b0   :  { %v473_v48 = vpop.trf.xlu1 }
 0x2b1   :  { %v499_v21 = vsel %vm172_vm1, %v473_v48, 0.0 }
 0x2b2   :  { %v500_v27 = vadd.f32 %v499_v21, %v498_v23 }
 0x2b3   :  { %v379_v52 = vpop.trf.xlu2 }
 0x2b4   :  { %v407_v4 = vsel %vm172_vm1, %v379_v52, 0.0 }
 0x2b5   :  { %v408_v11 = vadd.f32 %v407_v4, %v406_v6 }
 0x2b8   :  { %v474_v58 = vpop.trf.xlu1 }
 0x2b9   :  { %v501_v25 = vsel %vm172_vm1, %v474_v58, 0.0 }
 0x2ba   :  { %v502_v30 = vadd.f32 %v501_v25, %v500_v27 }
 0x2bb   :  { %v380_v63 = vpop.trf.xlu2 }
 0x2bc   :  { %v409_v8 = vsel %vm172_vm1, %v380_v63, 0.0 }
 0x2bd   :  { %v410_v14 = vadd.f32 %v409_v8, %v408_v11 }
 0x2c0   :  { %v475_v9 = vpop.trf.xlu1 }
 0x2c1   :  { %v503_v28 = vsel %vm172_vm1, %v475_v9, 0.0 }
 0x2c2   :  { %v504_v34 = vadd.f32 %v503_v28, %v502_v30 }
 0x2c3   :  { %v381_v15 = vpop.trf.xlu2 }
 0x2c4   :  { %v411_v17 = vsel %vm172_vm1, %v381_v15, 0.0 }
 0x2c5   :  { %v412_v19 = vadd.f32 %v411_v17, %v410_v14 }
 0x2c7   :  { %v413_v22 = vrot.slane %v412_v19, 4 }
 0x2c8   :  { %v476_v24 = vpop.trf.xlu1 }
 0x2c9   :  { %v414_v26 = vadd.f32 %v413_v22, %v412_v19  ;;  %v505_v33 = vsel %vm172_vm1, %v476_v24, 0.0 }
 0x2ca   :  { %v506_v37 = vadd.f32 %v505_v33, %v504_v34 }
 0x2cb   :  { %v415_v29 = vrot.slane %v414_v26, 2 }
 0x2cd   :  { %v416_v32 = vadd.f32 %v415_v29, %v414_v26 }
 0x2cf   :  { %v417_v35 = vrot.slane %v416_v32, 1 }
 0x2d0   :  { %v477_v38 = vpop.trf.xlu1 }
 0x2d1   :  { %v507_v39 = vsel %vm172_vm1, %v477_v38, 0.0  ;;  %v418_v40 = vadd.f32 %v417_v35, %v416_v32 }
 0x2d2   :  { %v508_v41 = vadd.f32 %v507_v39, %v506_v37 }
 0x2d3   :  { %v426_v42 = vadd.f32 %v425_v36, %v418_v40 }
 0x2d4   :  { %v509_v43 = vrot.slane %v508_v41, 4 }
 0x2d5   :  { %v427_v44 = vsub.f32 0.0, %v426_v42 }
 0x2d6   :  { %v510_v45 = vadd.f32 %v509_v43, %v508_v41 }
 0x2d7   :  { %v428_v46 = vmul.f32 1.442695, %v427_v44 }
 0x2d8   :  { %v511_v47 = vrot.slane %v510_v45, 2 }
 0x2d9   :  { %610 = vpow2.f32 %v428_v46 }
 0x2da   :  { %v512_v48 = vadd.f32 %v511_v47, %v510_v45 }
 0x2dc   :  { %v513_v49 = vrot.slane %v512_v48, 1 }
 0x2de   :  { %v514_v50 = vadd.f32 %v513_v49, %v512_v48 }
 0x2df   :  { %v611_v51 = vpop.eup %610 }
 0x2e0   :  { %v430_v52 = vadd.f32 1.0, %v611_v51  ;;  %v515_v53 = vadd.f32 %v514_v50, %v425_v36 }
 0x2e2   :  { %v516_v54 = vsub.f32 0.0, %v515_v53  ;;  %612 = vrcp.f32 %v430_v52  ;;  %vm436_vm9 = vweird.f32 %v430_v52  ;;  %v442_v2 = vand.u32 2147483648, %v430_v52 }
 0x2e3   :  { %v440_v4 = vand.u32 2147483647, %v430_v52 }
 0x2e4   :  { %v517_v55 = vmul.f32 1.442695, %v516_v54  ;;  %v443_v9 = vor.u32 1.1754944e-38, %v442_v2 }
 0x2e5   :  { %vm441_vm14 = vcmp.eq.f32.partialorder %v440_v4, 8.507059e+37 }
 0x2e6   :  { %614 = vpow2.f32 %v517_v55 }
 0x2e8   :  { %v613_v56 = vpop.eup %612 }
 0x2e9   :  { %v432_v58 = vmul.f32 %v613_v56, %v430_v52  ;;  %vm437_vm8 = vweird.f32 %v613_v56 }
 0x2ea   :  { %vm438_vm11 = vmor %vm436_vm9, %vm437_vm8 }
 0x2eb   :  { %v433_v60 = vsub.f32 1.0, %v432_v58 }
 0x2ec   :  { %v615_v57 = vpop.eup %614 }
 0x2ed   :  { %v519_v59 = vadd.f32 1.0, %v615_v57  ;;  %v434_v61 = vmul.f32 %v613_v56, %v433_v60 }
 0x2ef   :  { %616 = vrcp.f32 %v519_v59  ;;  %v435_v1 = vadd.f32 %v613_v56, %v434_v61  ;;  %v531_v3 = vand.u32 2147483648, %v519_v59  ;;  %v529_v6 = vand.u32 2147483647, %v519_v59 }
 0x2f0   :  { %vm525_vm12 = vweird.f32 %v519_v59 }
 0x2f1   :  { %v439_v7 = vsel %vm438_vm11, %v613_v56, %v435_v1  ;;  %v532_v10 = vor.u32 1.1754944e-38, %v531_v3  ;;  %vm530_vm15 = vcmp.eq.f32.partialorder %v529_v6, 8.507059e+37 }
 0x2f2   :  { %v444_v12 = vsel %vm441_vm14, %v443_v9, %v439_v7 }
 0x2f5   :  { %v617_v62 = vpop.eup %616 }
 0x2f6   :  { %v521_v63 = vmul.f32 %v617_v62, %v519_v59  ;;  %vm526_vm10 = vweird.f32 %v617_v62 }
 0x2f7   :  { %vm527_vm13 = vmor %vm525_vm12, %vm526_vm10 }
 0x2f8   :  { %v522_v0 = vsub.f32 1.0, %v521_v63 }
 0x2fa   :  { %v523_v5 = vmul.f32 %v617_v62, %v522_v0 }
 0x2fc   :  { %v524_v8 = vadd.f32 %v617_v62, %v523_v5 }
 0x2fe   :  { %v528_v11 = vsel %vm527_vm13, %v617_v62, %v524_v8 }
 0x2ff   :  { %v533_v13 = vsel %vm530_vm15, %v532_v10, %v528_v11 }
 0x300   :  { %v534_v14 = vsub.f32 %v444_v12, %v533_v13 }
 0x302   :  { %536 = vst.msk [vmem:[#allocation14] sm:$0x1] %vm535_vm0, %v534_v14 }
 0x303   :  { %547 = dma.vmem_to_hbm [thread:$0]  %s543_s7, 16, %s545_s20, [#allocation5]  }
 0x304   :  { %794 = dma.done.wait [#allocation5], 16  }
 0x305   :  { %795 = vsyncadd [#allocation5], 4294967280 }
 0x306   :  { %552 = vsyncpa [#allocation4], 1 }
 0x307   :  { %553 = vsyncpa [#allocation7], 1 }
 0x308   :  { %554 = vsyncpa [#allocation10], 1 }
 0x309   :  { %555 = vsyncpa [#allocation13], 1 }
 0x30a   :  { %556 = vsyncpa [#allocation5], 1 }

</bundles_post_ra>
